<compile_context>
chip_gen: v7x
topology: tpu7x:2x2x1
jax: 0.10.0
libtpu: 0.0.40
codegen_flags: <defaults>
</compile_context>

<pallas_src>
import functools

import jax
import jax.numpy as jnp
from jax.experimental import pallas as pl
from jax.experimental.pallas import tpu as pltpu


def _basic_block_kernel(x_ref, w1_ref, w2_ref, shift_ref, o_ref, *,
                        kernel_size, planes):
    x = x_ref[...]                                                    # (K, TL)
    sh = shift_ref[...]                                               # (P, 2) f32
    # conv1 (BN1 scale already folded into w1) -> shift -> ReLU.
    h = jnp.dot(w1_ref[...], x, preferred_element_type=jnp.float32)  # (P, TL) f32
    h = jnp.maximum(h + sh[:, 0:1], 0.0)
    # permute + conv2 (BN2 scale folded into w2) -> shift.
    h2 = jnp.dot(w2_ref[...], h.astype(w2_ref.dtype),
                 preferred_element_type=jnp.float32)                  # (P, TL) f32
    h2 = h2 + sh[:, 1:2]
    # Residual identity: torch.cat((x, x), dim=2) == row duplication when 2K==P.
    if kernel_size == planes:
        ident = x.astype(jnp.float32)
    else:
        ident = jnp.tile(x, (2, 1)).astype(jnp.float32)               # (P, TL)
    o_ref[...] = jnp.maximum(h2 + ident, 0.0).astype(o_ref.dtype)


def basic_block_forward(x, w1, w2, bn1_params, bn2_params, *,
                        kernel_size, planes, eps=1e-5,
                        activation_dtype=jnp.float32, lane_tile=8192):
    """x: (N, 1, K, W).  w1: (P,1,K,1), w2: (P,1,P,1).
    bn*_params = (gamma, beta, running_mean, running_var), each shape (P,)."""
    N, C, K, W = x.shape
    P = planes
    assert C == 1 and K == kernel_size
    assert kernel_size == planes or 2 * kernel_size == planes

    g1, b1, m1, v1 = [jnp.asarray(t, jnp.float32) for t in bn1_params]
    g2, b2, m2, v2 = [jnp.asarray(t, jnp.float32) for t in bn2_params]
    s1 = g1 / jnp.sqrt(v1 + eps)
    s2 = g2 / jnp.sqrt(v2 + eps)
    # Pack the two BN shifts into one lane-dense (P, 2) operand.
    shifts = jnp.stack([b1 - m1 * s1, b2 - m2 * s2], axis=1)          # (P, 2)

    # Fold BN scales into the conv weights (row-wise output-channel scale).
    w1m = (w1.reshape(P, K).astype(jnp.float32) * s1[:, None]).astype(activation_dtype)
    w2m = (w2.reshape(P, P).astype(jnp.float32) * s2[:, None]).astype(activation_dtype)

    # Lane-dense reformulation: collapse (N, W) into one lane axis L = N*W.
    L = N * W
    x2d = jnp.transpose(x.reshape(N, K, W), (1, 0, 2)).reshape(K, L)
    x2d = x2d.astype(activation_dtype)

    # Lane-chunk tiling: big (128-aligned) chunks; pad L up if needed.
    TL = lane_tile if L >= lane_tile else ((L + 127) // 128) * 128
    Lp = ((L + TL - 1) // TL) * TL
    if Lp != L:
        x2d = jnp.pad(x2d, ((0, 0), (0, Lp - L)))

    kernel = functools.partial(_basic_block_kernel,
                               kernel_size=kernel_size, planes=planes)

    out2d = pl.pallas_call(
        kernel,
        out_shape=jax.ShapeDtypeStruct((P, Lp), activation_dtype),
        grid_spec=pltpu.PrefetchScalarGridSpec(
            num_scalar_prefetch=0,
            grid=(Lp // TL,),
            in_specs=[
                pl.BlockSpec((K, TL), lambda l: (0, l)),   # x slab chunk
                pl.BlockSpec((P, K), lambda l: (0, 0)),    # fused conv1 weight
                pl.BlockSpec((P, P), lambda l: (0, 0)),    # fused conv2 weight
                pl.BlockSpec((P, 2), lambda l: (0, 0)),    # packed BN shifts
            ],
            out_specs=pl.BlockSpec((P, TL), lambda l: (0, l)),
        ),
        compiler_params=pltpu.CompilerParams(
            dimension_semantics=("parallel",)),
    )(x2d, w1m, w2m, shifts)

    out = jnp.transpose(out2d[:, :L].reshape(P, N, W), (1, 0, 2))     # (N, P, W)
    return out.reshape(N, 1, P, W).astype(x.dtype)


def _reference_forward(x, w1, w2, bn1_params, bn2_params, *,
                       kernel_size, planes, eps=1e-5):
    """Pure-JAX reference mirroring the PyTorch forward (inference BN)."""
    N, _, K, W = x.shape
    g1, b1, m1, v1 = bn1_params
    g2, b2, m2, v2 = bn2_params
    x3 = x.reshape(N, K, W)
    w1m = w1.reshape(planes, kernel_size)
    w2m = w2.reshape(planes, planes)

    out = jnp.einsum('pk,nkw->npw', w1m, x3)                     # conv1
    out = (out - m1[None, :, None]) / jnp.sqrt(v1 + eps)[None, :, None]
    out = out * g1[None, :, None] + b1[None, :, None]            # bn1
    out = jnp.maximum(out, 0.0)                                  # relu
    out = jnp.einsum('qp,npw->nqw', w2m, out)                    # permute+conv2
    out = (out - m2[None, :, None]) / jnp.sqrt(v2 + eps)[None, :, None]
    out = out * g2[None, :, None] + b2[None, :, None]            # bn2
    if kernel_size == planes:
        ident = x3
    else:
        ident = jnp.concatenate([x3, x3], axis=1)
    out = jnp.maximum(out + ident, 0.0)
    return out.reshape(N, 1, planes, W)


def _make_inputs(key, N, kernel_size, planes, W):
    ks = jax.random.split(key, 9)
    x = jax.random.normal(ks[0], (N, 1, kernel_size, W), dtype=jnp.float32)
    w1 = jax.random.normal(ks[1], (planes, 1, kernel_size, 1), dtype=jnp.float32) * 0.2
    w2 = jax.random.normal(ks[2], (planes, 1, planes, 1), dtype=jnp.float32) * 0.2
    bn1 = (1.0 + 0.1 * jax.random.normal(ks[3], (planes,), jnp.float32),
           0.05 * jax.random.normal(ks[4], (planes,), jnp.float32),
           0.1 * jax.random.normal(ks[5], (planes,), jnp.float32),
           jnp.ones((planes,), jnp.float32) * 0.9)
    bn2 = (1.0 + 0.1 * jax.random.normal(ks[6], (planes,), jnp.float32),
           0.05 * jax.random.normal(ks[7], (planes,), jnp.float32),
           0.1 * jax.random.normal(ks[8], (planes,), jnp.float32),
           jnp.ones((planes,), jnp.float32) * 1.1)
    return x, w1, w2, bn1, bn2


if __name__ == "__main__":
    key = jax.random.PRNGKey(0)
    k_a, k_b = jax.random.split(key)

    # Case 1: 2*K == P (exercises the torch.cat identity branch), f32 I/O.
    N, K, P, W = 2, 4, 8, 128
    x, w1, w2, bn1, bn2 = _make_inputs(k_a, N, K, P, W)
    out = basic_block_forward(x, w1, w2, bn1, bn2, kernel_size=K, planes=P)
    out = jax.block_until_ready(out)
    ref = _reference_forward(x, w1, w2, bn1, bn2, kernel_size=K, planes=P)
    assert out.shape == (N, 1, P, W)
    assert jnp.allclose(out, ref, atol=1e-5, rtol=1e-5), "f32 cat-branch mismatch"

    # Case 2: K == P (plain identity branch), f32 I/O.
    N2, K2, P2, W2 = 2, 8, 8, 128
    x2, w1b, w2b, bn1b, bn2b = _make_inputs(k_b, N2, K2, P2, W2)
    out2 = basic_block_forward(x2, w1b, w2b, bn1b, bn2b, kernel_size=K2, planes=P2)
    out2 = jax.block_until_ready(out2)
    ref2 = _reference_forward(x2, w1b, w2b, bn1b, bn2b, kernel_size=K2, planes=P2)
    assert jnp.allclose(out2, ref2, atol=1e-5, rtol=1e-5), "f32 identity mismatch"

    # Case 3: bf16 activation/weight I/O (f32 MXU accumulation) — bandwidth
    # optimization path; compared to the f32 reference with loose tolerance.
    out_bf16 = basic_block_forward(x, w1, w2, bn1, bn2, kernel_size=K, planes=P,
                                   activation_dtype=jnp.bfloat16)
    out_bf16 = jax.block_until_ready(out_bf16)
    assert jnp.allclose(out_bf16, ref, atol=7.5e-2, rtol=5e-2), "bf16 mismatch"

    print("KERNEL_OK")
</pallas_src>

<mosaic_0001>
module attributes {stable_mosaic.version = 11 : i64} {
  func.func @_basic_block_kernel(%arg0: i32, %arg1: memref<4x256xf32, #tpu.memory_space<vmem>>, %arg2: memref<8x4xf32, #tpu.memory_space<vmem>>, %arg3: memref<8x8xf32, #tpu.memory_space<vmem>>, %arg4: memref<8x2xf32, #tpu.memory_space<vmem>>, %arg5: memref<8x256xf32, #tpu.memory_space<vmem>>) attributes {dimension_semantics = [#tpu.dimension_semantics<parallel>], iteration_bounds = array<i64: 1>, scalar_prefetch = 0 : i64, scratch_operands = 0 : i64, tpu.core_type = #tpu.core_type<tc>, window_params = [{transform_indices = @transform_0, window_bounds = array<i64: 4, 256>}, {pipeline_mode = #tpu.pipeline_mode<synchronous>, transform_indices = @transform_1, window_bounds = array<i64: 8, 4>}, {pipeline_mode = #tpu.pipeline_mode<synchronous>, transform_indices = @transform_2, window_bounds = array<i64: 8, 8>}, {pipeline_mode = #tpu.pipeline_mode<synchronous>, transform_indices = @transform_3, window_bounds = array<i64: 8, 2>}, {transform_indices = @transform_4, window_bounds = array<i64: 8, 256>}]} {
    %c0 = arith.constant 0 : index
    %c0_0 = arith.constant 0 : index
    %0 = vector.load %arg1[%c0, %c0_0] : memref<4x256xf32, #tpu.memory_space<vmem>>, vector<4x256xf32>
    %c0_1 = arith.constant 0 : index
    %c0_2 = arith.constant 0 : index
    %1 = vector.load %arg4[%c0_1, %c0_2] : memref<8x2xf32, #tpu.memory_space<vmem>>, vector<8x2xf32>
    %c0_3 = arith.constant 0 : index
    %c0_4 = arith.constant 0 : index
    %2 = vector.load %arg2[%c0_3, %c0_4] : memref<8x4xf32, #tpu.memory_space<vmem>>, vector<8x4xf32>
    %cst = arith.constant dense<0.000000e+00> : vector<8x256xf32>
    %3 = tpu.matmul %2, %0, %cst {dimension_numbers = #tpu.dot_dimension_numbers<[1], [0], [0], [1], [0, 0, 1, 1], [], []>} : vector<8x4xf32>, vector<4x256xf32>, vector<8x256xf32> -> vector<8x256xf32>
    %4 = vector.extract_strided_slice %1 {offsets = [0, 0], sizes = [8, 1], strides = [1, 1]} : vector<8x2xf32> to vector<8x1xf32>
    %5 = vector.broadcast %4 : vector<8x1xf32> to vector<8x256xf32>
    %6 = arith.addf %3, %5 : vector<8x256xf32>
    %cst_5 = arith.constant 0.000000e+00 : f32
    %7 = vector.broadcast %cst_5 : f32 to vector<8x256xf32>
    %8 = arith.maximumf %6, %7 : vector<8x256xf32>
    %c0_6 = arith.constant 0 : index
    %c0_7 = arith.constant 0 : index
    %9 = vector.load %arg3[%c0_6, %c0_7] : memref<8x8xf32, #tpu.memory_space<vmem>>, vector<8x8xf32>
    %cst_8 = arith.constant dense<0.000000e+00> : vector<8x256xf32>
    %10 = tpu.matmul %9, %8, %cst_8 {dimension_numbers = #tpu.dot_dimension_numbers<[1], [0], [0], [1], [0, 0, 1, 1], [], []>} : vector<8x8xf32>, vector<8x256xf32>, vector<8x256xf32> -> vector<8x256xf32>
    %11 = vector.extract_strided_slice %1 {offsets = [0, 1], sizes = [8, 1], strides = [1, 1]} : vector<8x2xf32> to vector<8x1xf32>
    %12 = vector.broadcast %11 : vector<8x1xf32> to vector<8x256xf32>
    %13 = arith.addf %10, %12 : vector<8x256xf32>
    %14 = tpu.concatenate %0, %0 in 0 : vector<4x256xf32>, vector<4x256xf32> -> vector<8x256xf32>
    %15 = arith.addf %13, %14 : vector<8x256xf32>
    %cst_9 = arith.constant 0.000000e+00 : f32
    %16 = vector.broadcast %cst_9 : f32 to vector<8x256xf32>
    %17 = arith.maximumf %15, %16 : vector<8x256xf32>
    %c0_10 = arith.constant 0 : index
    %c0_11 = arith.constant 0 : index
    %18 = vector.load %arg5[%c0_10, %c0_11] : memref<8x256xf32, #tpu.memory_space<vmem>>, vector<8x256xf32>
    tpu.vector_store %arg5[%c0_10, %c0_11], %17 {strides = array<i32>} : memref<8x256xf32, #tpu.memory_space<vmem>>, vector<8x256xf32>,
    return
  }
  func.func @transform_0(%arg0: i32) -> (i32, i32) {
    %c0_i32 = arith.constant 0 : i32
    %c0_i32_0 = arith.constant 0 : i32
    return %c0_i32, %arg0 : i32, i32
  }
  func.func @transform_1(%arg0: i32) -> (i32, i32) {
    %c0_i32 = arith.constant 0 : i32
    %c0_i32_0 = arith.constant 0 : i32
    %c0_i32_1 = arith.constant 0 : i32
    return %c0_i32, %c0_i32_0 : i32, i32
  }
  func.func @transform_2(%arg0: i32) -> (i32, i32) {
    %c0_i32 = arith.constant 0 : i32
    %c0_i32_0 = arith.constant 0 : i32
    %c0_i32_1 = arith.constant 0 : i32
    return %c0_i32, %c0_i32_0 : i32, i32
  }
  func.func @transform_3(%arg0: i32) -> (i32, i32) {
    %c0_i32 = arith.constant 0 : i32
    %c0_i32_0 = arith.constant 0 : i32
    %c0_i32_1 = arith.constant 0 : i32
    return %c0_i32, %c0_i32_0 : i32, i32
  }
  func.func @transform_4(%arg0: i32) -> (i32, i32) {
    %c0_i32 = arith.constant 0 : i32
    %c0_i32_0 = arith.constant 0 : i32
    return %c0_i32, %arg0 : i32, i32
  }
}

</mosaic_0001>

<bundles_post_ra>
// kernel: tpu_custom_call.1
= control target key start
LH: loop header
LB: loop body
LE: loop exit
PB: predicated region body
PF: predicated region fallthrough
CT: control target
= control target key end

     0   :  { %vm32_vm0 = vcmask 1043456   ;;  %v251_v2 = vmov 0.0   ;;  %v252_v3 = vmov 0   ;;  %s308_s0 = inlined_call_operand.vmem [shape: f32[4,256], index: 0, kind: input, shape index: {}]   ;;  %s309_s1 = inlined_call_operand.vmem [shape: f32[8,4], index: 1, kind: input, shape index: {}]   ;;  %s310_s2 = inlined_call_operand.vmem [shape: f32[8,8], index: 2, kind: input, shape index: {}]   ;;  %s311_s3 = inlined_call_operand.vmem [shape: f32[8,2], index: 3, kind: input, shape index: {}]   ;;  %s312_s4 = inlined_call_operand.hbm [shape: f32[8,256], index: 4, kind: output, shape index: {}]  }
   0x1   :  { %v18_v0 = vld [vmem:[%s308_s0] sm:$0xff]  ;;  %101 = vmatprep.mubr.f32.mxu0 %v251_v2  ;;  %223 = vset.pattern.permute.xlu0 %v252_v3 }
   0x2   :  { %v27_v1 = vcombine.high %v18_v0, %v18_v0  ;;  %v19_v4 = vld [vmem:[%s311_s3] sm:$0xff] }
   0x3   :  { %9 = vsyncpa [#allocation3], 0  ;;  %v20_v5 = vld [vmem:[%s309_s1] sm:$0xff]  ;;  %vm28_vm1 = vcmask 31744   ;;  %23 = vperm.xlu0 %223, %v19_v4   ;;  %183 = vmatprep.mubr.f32.mxu1 %v251_v2  ;;  %v253_v6 = vmov 1   ;;  %vm115_vm2 = vcmask 64512   ;;  %v191_v15 = vcombine.low %v18_v0, %v18_v0 }
   0x4   :  { %215 = vmatprep.subr.msk.mxu0 %vm32_vm0, %v27_v1  ;;  %v110_v14 = vld [vmem:[%s310_s2] sm:$0xff]  ;;  %v194_v21 = vsel %vm32_vm0, %v27_v1, %v18_v0  ;;  %s254_s3 = smov [#allocation2]  }
   0x5   :  { %216 = vmatpush1.msk.msra.mxu0 %vm32_vm0, %v18_v0  ;;  %v193_v18 = vsel %vm32_vm0, %v18_v0, %v191_v15  ;;  %s207_s21 = sshll.u32 %s254_s3, 4  ;;  %s208_s21 = int_to_ptr.vmem [resolvable:$true] %s207_s21 }
   0x6   :  { %217 = vmatmul.mubr.msk.f32.vlgmr.msra.gmra.mrb[0].mxu0 %vm28_vm1, %v20_v5  ;;  %s227_s2 = scalar_lea.vmem %s208_s21, 256  ;;  %p232_p1 = scmp.lt.s32.totalorder %s208_s21, %s208_s21 }
   0x7   :  { %224 = vset.pattern.permute.xlu0 %v253_v6  ;;  %p228_p0 = scmp.ne.s32.totalorder %s208_s21, %s227_s2  ;;  %p233_p2 = scmp.lt.s32.totalorder %s227_s2, %s227_s2 }
   0x8   :  { %112 = vperm.xlu0 %224, %v19_v4  }
   0x9   :  { %p234_p3 = por %p233_p2, %p232_p1 }
   0xb   :  { %p235_p4 = pnand %p234_p3, %p228_p0 }
  0x82   :  { %v24_v7 = vpop.permute.xlu0 %23 }
  0x87   :  { %v113_v16 = vpop.permute.xlu0 %112 }
  0xd9   :  { %v103_v8 = vpop.f32.mrb[0].mxu0 }
  0xda   :  { %v104_v9 = vadd.f32 %v103_v8, %v24_v7  ;;  %v105_v10 = vpop.f32.mrb[1].mxu0 }
  0xdb   :  { %v106_v11 = vadd.f32 %v105_v10, %v24_v7 }
  0xdc   :  { %v108_v13 = vmax.f32 %v104_v9, 0.0 }
  0xdd   :  { %v109_v12 = vmax.f32 %v106_v11, 0.0 }
  0xdf   :  { %119 = vmatprep.subr.mxu1 %v109_v12 }
  0xe0   :  { %120 = vmatpush1.msra.mxu1 %v108_v13 }
  0xe1   :  { %218 = vmatmul.mubr.msk.f32.vlgmr.msra.gmra.mrb[0].mxu1 %vm115_vm2, %v110_v14 }
 0x1b4   :  { %v185_v17 = vpop.f32.mrb[0].mxu1 }
 0x1b5   :  { %v186_v19 = vadd.f32 %v185_v17, %v113_v16  ;;  %v187_v20 = vpop.f32.mrb[1].mxu1 }
 0x1b6   :  { %v188_v22 = vadd.f32 %v187_v20, %v113_v16 }
 0x1b7   :  { %v195_v23 = vadd.f32 %v193_v18, %v186_v19 }
 0x1b8   :  { %v196_v24 = vadd.f32 %v194_v21, %v188_v22 }
 0x1b9   :  { %v197_v25 = vmax.f32 %v195_v23, 0.0 }
 0x1ba   :  { %v198_v26 = vmax.f32 %v196_v24, 0.0 }
 0x1bb   :  { %199 = vst [vmem:[#allocation2] sm:$0xff] %v197_v25 }
 0x1bc   :  { %200 = vst [vmem:[#allocation2 + $0x8] sm:$0xff] %v198_v26 }
 0x1bd   :  { %238 = shalt.err (!%p235_p4)
}
 0x1be   :  { %s239_s24 = scalar_lea.hbm %s312_s4, 256 }
 0x1bf   :  { %p240_p5 = scmp.ne.s32.totalorder %s312_s4, %s239_s24  ;;  %p243_p6 = scmp.lt.u32.totalorder %s239_s24, %s312_s4 }
 0x1c1   :  { %p245_p7 = pnand %p243_p6, %p240_p5 }
 0x1c3   :  { %248 = shalt.err (!%p245_p7)
}
 0x1c4   :  { %210 = dma.vmem_to_hbm [thread:$0]  %s208_s21, 256, %s312_s4, [#allocation3]  }
 0x1c5   :  { %249 = dma.done.wait [#allocation3], 256  }
 0x1c6   :  { %250 = vsyncadd [#allocation3], 4294967040 }
 0x1c7   :  { %214 = vsyncpa [#allocation3], 1 }

</bundles_post_ra>
